<compile_context>
chip_gen: v7x
topology: tpu7x:2x2x1
jax: 0.10.0
libtpu: 0.0.40
codegen_flags: <defaults>
</compile_context>

<pallas_src>
import math

import jax
import jax.numpy as jnp
from jax.experimental import pallas as pl
from jax.experimental.pallas import tpu as pltpu


# ----------------------------------------------------------------------------- helpers
def _round_up(x, m):
    return ((x + m - 1) // m) * m


def _tpu_vmem_capacity_bytes():
    try:
        return int(pltpu.get_tpu_info().vmem_capacity_bytes)
    except Exception:
        return 64 * 1024 * 1024  # conservative (v7x) fallback


def _device_kind():
    try:
        return jax.devices()[0].device_kind.lower()
    except Exception:
        return ""


def _lane_multiple():
    # v6e/v7x MXUs are 2x 256x256 -> prefer 256-wide feature slabs; v5e (4x 128x128) keeps 128.
    kind = _device_kind()
    return 256 if ("v6" in kind or "v7" in kind) else 128


def _is_v7():
    return "v7" in _device_kind()


def _padded_features(nf, lane_mult):
    nf_p = _round_up(nf, 128)
    if lane_mult == 256 and nf_p > 128 and nf_p % 256 != 0:
        nf_p = _round_up(nf, 256)
    return nf_p


def _divisor_tiles(nf_p):
    """All tile widths (multiples of 128) that exactly divide nf_p, descending."""
    u_total = nf_p // 128
    return [128 * u for u in range(u_total, 0, -1) if u_total % u == 0]


def _footprint_bytes(tm, tn, nf_p, x_item, w_item):
    """Double-buffered VMEM footprint of all pipelined inputs/outputs."""
    x_full = 2 * tm * nf_p * x_item      # full row tile of x (matmul operand)
    x_res = 2 * tm * tn * x_item         # residual slice of x
    w_tile = 2 * nf_p * tn * w_item      # weight column tile (double-buffered!)
    b_tile = 2 * tn * 4                  # bias tile
    o_tile = 2 * tm * tn * x_item        # output tile
    return x_full + x_res + w_tile + b_tile + o_tile


def _choose_tiles(M, nf_p, lane_mult, x_item, w_item, budget, want_split):
    """Pick (tm, tn, M_p). tn always divides nf_p exactly; tm is a multiple of 8."""
    M_8 = _round_up(max(int(M), 1), 8)

    # Row tile: exact single tile for small/medium batches (zero padding waste),
    # otherwise the largest of {512, 256, 128} with acceptable padding waste.
    if M_8 <= 1024:
        tm = M_8
    else:
        tm = 128
        for cand in (512, 256):
            waste = _round_up(M_8, cand) - M_8
            if waste <= max(M_8 // 8, cand // 4):
                tm = cand
                break

    # Output-feature tile: largest exact divisor of nf_p whose footprint fits budget.
    tiles = _divisor_tiles(nf_p)
    tn = tiles[-1]  # 128 fallback
    for cand in tiles:
        if _footprint_bytes(tm, cand, nf_p, x_item, w_item) <= budget:
            tn = cand
            break

    # Last resort: shrink the row tile, but never below 128 (or below the batch itself).
    tm_floor = min(tm, 128)
    while tm > tm_floor and _footprint_bytes(tm, tn, nf_p, x_item, w_item) > budget:
        tm = max(tm_floor, _round_up(tm // 2, 8))

    M_p = _round_up(M_8, tm)

    # v7x: a small-batch call with a fully-resident weight would have a 1-step grid,
    # leaving one TensorCore idle. Split the output-feature axis (keeping MXU-width
    # tiles) to expose a second parallel step; harmless elsewhere.
    if want_split and (M_p // tm) == 1 and tn == nf_p and len(tiles) > 1:
        for cand in tiles[1:]:
            if cand % lane_mult == 0 or lane_mult == 128:
                tn = cand
                break

    return tm, tn, M_p


# ----------------------------------------------------------------------------- kernel
def _skip_block_kernel(x_ref, xr_ref, wt_ref, b_ref, o_ref):
    # x_ref : (tm, nf_p)   full input-feature row tile (matmul operand, native dtype)
    # xr_ref: (tm, tn)     residual slice matching this output column tile
    # wt_ref: (nf_p, tn)   weight column tile, [in, out] layout
    # b_ref : (1, tn)      bias tile
    # o_ref : (tm, tn)
    y = jnp.dot(x_ref[...], wt_ref[...], preferred_element_type=jnp.float32)
    y = y + b_ref[...].astype(jnp.float32)
    silu = y * jax.nn.sigmoid(y)
    o_ref[...] = (silu + xr_ref[...].astype(jnp.float32)).astype(o_ref.dtype)


# ----------------------------------------------------------------------------- wrappers
def prepare_skip_block_params(w, b, lane_mult=None):
    """One-time per-layer prep: transpose torch-layout weight and pad to lane width.

    w: (nf, nf) in torch layout [out, in];  b: (nf,).
    Returns wt_p (nf_p, nf_p) in [in, out] layout and b_p (1, nf_p).
    """
    nf = w.shape[0]
    assert w.shape == (nf, nf) and b.shape == (nf,)
    if lane_mult is None:
        lane_mult = _lane_multiple()
    nf_p = _padded_features(nf, lane_mult)

    wt = w.T  # (in, out) — done once per layer, not per forward call
    if nf_p != nf:
        wt_p = jnp.pad(wt, ((0, nf_p - nf), (0, nf_p - nf)))
        b_p = jnp.pad(b, (0, nf_p - nf)).reshape(1, nf_p)
    else:
        wt_p = wt
        b_p = b.reshape(1, nf_p)
    return wt_p, b_p


def skip_block_prepared(x, wt_p, b_p):
    """x: (M, nf). wt_p/b_p from prepare_skip_block_params. Returns SiLU(xW^T+b)+x."""
    M, nf = x.shape
    nf_p = wt_p.shape[0]
    assert wt_p.shape == (nf_p, nf_p) and b_p.shape == (1, nf_p) and nf <= nf_p

    lane_mult = _lane_multiple()
    x_item = jnp.dtype(x.dtype).itemsize
    w_item = jnp.dtype(wt_p.dtype).itemsize

    # Per-generation VMEM ceiling: <= 3/4 of physical capacity, never above 100 MiB
    # (v7x: ~48 MiB usable of 64 MiB; v5e/v6e: ~96-100 MiB of 128 MiB).
    cap = _tpu_vmem_capacity_bytes()
    ceiling = int(min(100 * 1024 * 1024, (cap * 3) // 4))
    budget = ceiling - 4 * 1024 * 1024  # headroom for compiler-internal scratch

    tm, tn, M_p = _choose_tiles(M, nf_p, lane_mult, x_item, w_item, budget, _is_v7())

    # Zero-pad x: padded in-features contribute 0 to the dot; padded rows/columns
    # are sliced off below, so the math is exact.
    if M_p != M or nf_p != nf:
        x_p = jnp.pad(x, ((0, M_p - M), (0, nf_p - nf)))
    else:
        x_p = x

    needed = _footprint_bytes(tm, tn, nf_p, x_item, w_item)
    vmem_limit = int(min(ceiling, max(32 * 1024 * 1024,
                                      needed + max(needed // 4, 4 * 1024 * 1024))))

    grid = (M_p // tm, nf_p // tn)

    out_p = pl.pallas_call(
        _skip_block_kernel,
        out_shape=jax.ShapeDtypeStruct((M_p, nf_p), x.dtype),
        grid_spec=pltpu.PrefetchScalarGridSpec(
            num_scalar_prefetch=0,
            grid=grid,
            in_specs=[
                # full input-feature row tile (constant across j -> fetched once per i)
                pl.BlockSpec((tm, nf_p), lambda i, j: (i, 0)),
                # residual slice matching this output column tile
                pl.BlockSpec((tm, tn), lambda i, j: (i, j)),
                # weight column tile [in, out]
                pl.BlockSpec((nf_p, tn), lambda i, j: (0, j)),
                # bias tile
                pl.BlockSpec((1, tn), lambda i, j: (0, j)),
            ],
            out_specs=pl.BlockSpec((tm, tn), lambda i, j: (i, j)),
        ),
        compiler_params=pltpu.CompilerParams(
            # both axes are fully independent (K is un-tiled) -> shard across TCs
            dimension_semantics=("parallel", "parallel"),
            vmem_limit_bytes=vmem_limit,
        ),
    )(x_p, x_p, wt_p, b_p)

    if M_p == M and nf_p == nf:
        return out_p
    return out_p[:M, :nf]


def skip_block(x, w, b):
    """Convenience one-shot path (prep + apply). Prefer prepare_* + jit per layer."""
    wt_p, b_p = prepare_skip_block_params(w, b)
    return skip_block_prepared(x, wt_p, b_p)


def skip_block_ref(x, w, b):
    y = x.astype(jnp.float32) @ w.T.astype(jnp.float32) + b.astype(jnp.float32)
    return (y * jax.nn.sigmoid(y) + x.astype(jnp.float32)).astype(x.dtype)


# ----------------------------------------------------------------------------- demo / test
if __name__ == "__main__":
    key = jax.random.PRNGKey(0)
    kx, kw, kb, kx2 = jax.random.split(key, 4)

    batch = 8
    nfeatures = 32

    x = jax.random.normal(kx, (batch, nfeatures), dtype=jnp.float32)
    # Deterministic init matching nn.Linear's default uniform(-1/sqrt(nf), 1/sqrt(nf))
    bound = 1.0 / math.sqrt(nfeatures)
    w = jax.random.uniform(kw, (nfeatures, nfeatures), jnp.float32, -bound, bound)
    b = jax.random.uniform(kb, (nfeatures,), jnp.float32, -bound, bound)

    # Per-layer prep hoisted out of the forward path; whole forward jitted so the
    # x-pad fuses and the prepped params are reused across calls.
    wt_p, b_p = prepare_skip_block_params(w, b)
    fwd = jax.jit(lambda xx: skip_block_prepared(xx, wt_p, b_p))

    out = jax.block_until_ready(fwd(x))
    ref = skip_block_ref(x, w, b)
    assert jnp.allclose(out, ref, atol=1e-5, rtol=1e-5), "mismatch vs JAX reference (aligned case)"

    # Ragged batch (exercises remainder / padding path)
    x2 = jax.random.normal(kx2, (6, nfeatures), dtype=jnp.float32)
    out2 = jax.block_until_ready(fwd(x2))
    ref2 = skip_block_ref(x2, w, b)
    assert jnp.allclose(out2, ref2, atol=1e-5, rtol=1e-5), "mismatch vs JAX reference (ragged case)"

    # Convenience one-shot path
    out3 = jax.block_until_ready(skip_block(x, w, b))
    assert jnp.allclose(out3, ref, atol=1e-5, rtol=1e-5), "mismatch vs JAX reference (one-shot path)"

    print("KERNEL_OK")
</pallas_src>

<mosaic_0001>
module attributes {stable_mosaic.version = 11 : i64} {
  func.func @_skip_block_kernel(%arg0: i32, %arg1: i32, %arg2: memref<8x128xf32, #tpu.memory_space<vmem>>, %arg3: memref<8x128xf32, #tpu.memory_space<vmem>>, %arg4: memref<128x128xf32, #tpu.memory_space<vmem>>, %arg5: memref<1x128xf32, #tpu.memory_space<vmem>>, %arg6: memref<8x128xf32, #tpu.memory_space<vmem>>) attributes {dimension_semantics = [#tpu.dimension_semantics<parallel>, #tpu.dimension_semantics<parallel>], iteration_bounds = array<i64: 1, 1>, scalar_prefetch = 0 : i64, scratch_operands = 0 : i64, tpu.core_type = #tpu.core_type<tc>, window_params = [{transform_indices = @transform_0, window_bounds = array<i64: 8, 128>}, {transform_indices = @transform_1, window_bounds = array<i64: 8, 128>}, {transform_indices = @transform_2, window_bounds = array<i64: 128, 128>}, {transform_indices = @transform_3, window_bounds = array<i64: 1, 128>}, {transform_indices = @transform_4, window_bounds = array<i64: 8, 128>}]} {
    %c0 = arith.constant 0 : index
    %c0_0 = arith.constant 0 : index
    %0 = vector.load %arg2[%c0, %c0_0] : memref<8x128xf32, #tpu.memory_space<vmem>>, vector<8x128xf32>
    %c0_1 = arith.constant 0 : index
    %c0_2 = arith.constant 0 : index
    %1 = vector.load %arg4[%c0_1, %c0_2] : memref<128x128xf32, #tpu.memory_space<vmem>>, vector<128x128xf32>
    %cst = arith.constant dense<0.000000e+00> : vector<8x128xf32>
    %2 = tpu.matmul %0, %1, %cst {dimension_numbers = #tpu.dot_dimension_numbers<[1], [0], [0], [1], [0, 0, 1, 1], [], []>} : vector<8x128xf32>, vector<128x128xf32>, vector<8x128xf32> -> vector<8x128xf32>
    %c0_3 = arith.constant 0 : index
    %c0_4 = arith.constant 0 : index
    %3 = vector.load %arg5[%c0_3, %c0_4] : memref<1x128xf32, #tpu.memory_space<vmem>>, vector<1x128xf32>
    %4 = vector.broadcast %3 : vector<1x128xf32> to vector<8x128xf32>
    %5 = arith.addf %2, %4 : vector<8x128xf32>
    %6 = arith.negf %5 : vector<8x128xf32>
    %7 = math.exp %6 : vector<8x128xf32>
    %cst_5 = arith.constant 1.000000e+00 : f32
    %8 = vector.broadcast %cst_5 : f32 to vector<8x128xf32>
    %9 = arith.addf %8, %7 : vector<8x128xf32>
    %10 = arith.divf %8, %9 : vector<8x128xf32>
    %11 = arith.mulf %5, %10 : vector<8x128xf32>
    %c0_6 = arith.constant 0 : index
    %c0_7 = arith.constant 0 : index
    %12 = vector.load %arg3[%c0_6, %c0_7] : memref<8x128xf32, #tpu.memory_space<vmem>>, vector<8x128xf32>
    %13 = arith.addf %11, %12 : vector<8x128xf32>
    %c0_8 = arith.constant 0 : index
    %c0_9 = arith.constant 0 : index
    %14 = vector.load %arg6[%c0_8, %c0_9] : memref<8x128xf32, #tpu.memory_space<vmem>>, vector<8x128xf32>
    tpu.vector_store %arg6[%c0_8, %c0_9], %13 {strides = array<i32>} : memref<8x128xf32, #tpu.memory_space<vmem>>, vector<8x128xf32>,
    return
  }
  func.func @transform_0(%arg0: i32, %arg1: i32) -> (i32, i32) {
    %c0_i32 = arith.constant 0 : i32
    %c0_i32_0 = arith.constant 0 : i32
    return %arg0, %c0_i32 : i32, i32
  }
  func.func @transform_1(%arg0: i32, %arg1: i32) -> (i32, i32) {
    %c0_i32 = arith.constant 0 : i32
    return %arg0, %arg1 : i32, i32
  }
  func.func @transform_2(%arg0: i32, %arg1: i32) -> (i32, i32) {
    %c0_i32 = arith.constant 0 : i32
    %c0_i32_0 = arith.constant 0 : i32
    return %c0_i32, %arg1 : i32, i32
  }
  func.func @transform_3(%arg0: i32, %arg1: i32) -> (i32, i32) {
    %c0_i32 = arith.constant 0 : i32
    %c0_i32_0 = arith.constant 0 : i32
    return %c0_i32, %arg1 : i32, i32
  }
  func.func @transform_4(%arg0: i32, %arg1: i32) -> (i32, i32) {
    %c0_i32 = arith.constant 0 : i32
    return %arg0, %arg1 : i32, i32
  }
}

</mosaic_0001>

<bundles_post_ra>
// kernel: _lambda_.1
= control target key start
LH: loop header
LB: loop body
LE: loop exit
PB: predicated region body
PF: predicated region fallthrough
CT: control target
= control target key end

     0   :  { %9 = vsyncpa [#allocation3], 0  ;;  %s353_s0 = inlined_call_operand.vmem [shape: f32[8,128], index: 0, kind: input, shape index: {}, may-alias: {0,1}]   ;;  %s354_s1 = inlined_call_operand.vmem [shape: f32[8,128], index: 1, kind: input, shape index: {}, may-alias: {0,1}]   ;;  %s355_s2 = inlined_call_operand.hbm [shape: f32[128,128], index: 2, kind: input, shape index: {}]   ;;  %s356_s3 = inlined_call_operand.vmem [shape: f32[1,128], index: 3, kind: input, shape index: {}]   ;;  %s357_s4 = inlined_call_operand.hbm [shape: f32[8,128], index: 4, kind: output, shape index: {}]  }
   0x1   :  { %10 = vsyncpa [#allocation4], 0  ;;  %s288_s15 = smov [#allocation2]   ;;  %s240_s19 = scalar_lea.hbm %s355_s2, 2048 }
   0x2   :  { %s20_s16 = sshll.u32 %s288_s15, 4  ;;  %p241_p0 = scmp.ne.s32.totalorder %s355_s2, %s240_s19  ;;  %s21_s16 = int_to_ptr.vmem [resolvable:$true] %s20_s16 }
   0x3   :  { %p244_p1 = scmp.lt.u32.totalorder %s240_s19, %s355_s2 }
   0x5   :  { %p246_p2 = pnand %p244_p1, %p241_p0 }
   0x7   :  { %249 = shalt.err (!%p246_p2)
}
   0x8   :  { %s250_s24 = scalar_lea.vmem %s21_s16, 2048  ;;  %p255_p4 = scmp.lt.s32.totalorder %s21_s16, %s21_s16 }
   0x9   :  { %p251_p3 = scmp.ne.s32.totalorder %s21_s16, %s250_s24  ;;  %p256_p5 = scmp.lt.s32.totalorder %s250_s24, %s250_s24 }
   0xb   :  { %p257_p6 = por %p256_p5, %p255_p4 }
   0xd   :  { %p258_p7 = pnand %p257_p6, %p251_p3 }
   0xf   :  { %261 = shalt.err (!%p258_p7)
}
  0x10   :  { %s289_s25 = smov 128   ;;  %s290_s26 = smov 8  }
  0x11   :  { %26 = dma.hbm_to_vmem [thread:$0]  %s355_s2, 2048, %s21_s16, [#allocation3], %s289_s25, %s289_s25, %s290_s26  }
  0x12   :  { %284 = dma.done.wait [#allocation3], 2048  }
  0x13   :  { %285 = vsyncadd [#allocation3], 4294965248  ;;  %v291_v0 = vmov 0.0|0.0   ;;  %vm292_vm0 = vmmov 0   ;;  %v293_v1 = vmov 0.0   ;;  %v33_v2 = vld [vmem:[#allocation2] sm:$0xff] }
  0x14   :  { %205 = vmatprep.subr.bf16.mxu0 %v291_v0  ;;  %202 = vmatprep.mubr.msk.f32.mxu0 %vm292_vm0, %v293_v1  ;;  %v34_v3 = vld [vmem:[#allocation2 + $0x8] sm:$0xff]  ;;  %v35_v4 = vld [vmem:[#allocation2 + $0x10] sm:$0xff]  ;;  %v36_v6 = vld [vmem:[#allocation2 + $0x18] sm:$0xff]  ;;  %s294_s8 = smov [#allocation5]  }
  0x15   :  { %v206_v5 = vpack.c.bf16 %v34_v3, %v33_v2  ;;  %v209_v7 = vpack.c.bf16 %v36_v6, %v35_v4  ;;  %v37_v8 = vld [vmem:[#allocation2 + $0x20] sm:$0xff]  ;;  %v38_v9 = vld [vmem:[#allocation2 + $0x28] sm:$0xff]  ;;  %v39_v11 = vld [vmem:[#allocation2 + $0x30] sm:$0xff] }
  0x16   :  { %v212_v10 = vpack.c.bf16 %v38_v9, %v37_v8  ;;  %v40_v12 = vld [vmem:[#allocation2 + $0x38] sm:$0xff]  ;;  %v41_v14 = vld [vmem:[#allocation2 + $0x40] sm:$0xff]  ;;  %v42_v15 = vld [vmem:[#allocation2 + $0x48] sm:$0xff] }
  0x17   :  { %207 = vmatpush3.bf16.msra.mxu0 %v206_v5  ;;  %v215_v13 = vpack.c.bf16 %v40_v12, %v39_v11  ;;  %v218_v16 = vpack.c.bf16 %v42_v15, %v41_v14  ;;  %v43_v17 = vld [vmem:[#allocation2 + $0x50] sm:$0xff]  ;;  %v44_v18 = vld [vmem:[#allocation2 + $0x58] sm:$0xff]  ;;  %v45_v20 = vld [vmem:[#allocation2 + $0x60] sm:$0xff] }
  0x18   :  { %208 = vmatprep.subr.bf16.mxu0 %v291_v0  ;;  %v221_v19 = vpack.c.bf16 %v44_v18, %v43_v17  ;;  %v46_v21 = vld [vmem:[#allocation2 + $0x68] sm:$0xff]  ;;  %v47_v23 = vld [vmem:[#allocation2 + $0x70] sm:$0xff]  ;;  %v48_v24 = vld [vmem:[#allocation2 + $0x78] sm:$0xff] }
  0x19   :  { %v224_v22 = vpack.c.bf16 %v46_v21, %v45_v20  ;;  %v227_v25 = vpack.c.bf16 %v48_v24, %v47_v23  ;;  %v32_v26 = vld [vmem:[%s353_s0] sm:$0xff]  ;;  %s142_s0 = sshll.u32 %s294_s8, 4  ;;  %s143_s0 = int_to_ptr.vmem [resolvable:$true] %s142_s0 }
  0x1a   :  { %v151_v27 = vld [vmem:[%s356_s3] ss:$0 sm:$0xff]  ;;  %s262_s3 = scalar_lea.vmem %s143_s0, 128  ;;  %p267_p9 = scmp.lt.s32.totalorder %s143_s0, %s143_s0 }
  0x1b   :  { %210 = vmatpush3.bf16.msra.mxu0 %v209_v7  ;;  %v133_v35 = vld [vmem:[%s354_s1] sm:$0xff]  ;;  %p263_p8 = scmp.ne.s32.totalorder %s143_s0, %s262_s3  ;;  %p268_p10 = scmp.lt.s32.totalorder %s262_s3, %s262_s3 }
  0x1c   :  { %211 = vmatprep.subr.bf16.mxu0 %v291_v0 }
  0x1d   :  { %p269_p11 = por %p268_p10, %p267_p9 }
  0x1f   :  { %213 = vmatpush3.bf16.msra.mxu0 %v212_v10  ;;  %p270_p12 = pnand %p269_p11, %p263_p8 }
  0x20   :  { %214 = vmatprep.subr.bf16.mxu0 %v291_v0 }
  0x23   :  { %216 = vmatpush3.bf16.msra.mxu0 %v215_v13 }
  0x24   :  { %217 = vmatprep.subr.bf16.mxu0 %v291_v0 }
  0x27   :  { %219 = vmatpush3.bf16.msra.mxu0 %v218_v16 }
  0x28   :  { %220 = vmatprep.subr.bf16.mxu0 %v291_v0 }
  0x2b   :  { %222 = vmatpush3.bf16.msra.mxu0 %v221_v19 }
  0x2c   :  { %223 = vmatprep.subr.bf16.mxu0 %v291_v0 }
  0x2f   :  { %225 = vmatpush3.bf16.msra.mxu0 %v224_v22 }
  0x30   :  { %226 = vmatprep.subr.bf16.mxu0 %v291_v0 }
  0x33   :  { %228 = vmatpush3.bf16.msra.mxu0 %v227_v25 }
  0x36   :  { %203 = vmatmul.mubr.f32.vlgmr.msra.gmra.mrb[0].mxu0 %v32_v26 }
 0x109   :  { %v122_v28 = vpop.f32.mrb[0].mxu0 }
 0x10a   :  { %v123_v29 = vadd.f32 %v151_v27, %v122_v28  ;;  %v204_v30 = vpop.f32.mrb[1].mxu0 }
 0x10c   :  { %v152_v31 = vmul.f32 -1.442695, %v123_v29 }
 0x10e   :  { %236 = vpow2.f32 %v152_v31 }
 0x118   :  { %v237_v32 = vpop.eup %236 }
 0x119   :  { %v129_v33 = vadd.f32 1.0, %v237_v32 }
 0x11b   :  { %238 = vrcp.f32 %v129_v33 }
 0x125   :  { %v239_v34 = vpop.eup %238 }
 0x126   :  { %v132_v36 = vmul.f32 %v239_v34, %v123_v29 }
 0x128   :  { %v134_v37 = vadd.f32 %v133_v35, %v132_v36 }
 0x12a   :  { %135 = vst [vmem:[#allocation5] sm:$0xff] %v134_v37 }
 0x12b   :  { %273 = shalt.err (!%p270_p12)
}
 0x12c   :  { %s274_s11 = scalar_lea.hbm %s357_s4, 128 }
 0x12d   :  { %p275_p13 = scmp.ne.s32.totalorder %s357_s4, %s274_s11  ;;  %p278_p0 = scmp.lt.u32.totalorder %s274_s11, %s357_s4 }
 0x12f   :  { %p280_p1 = pnand %p278_p0, %p275_p13 }
 0x131   :  { %283 = shalt.err (!%p280_p1)
}
 0x132   :  { %145 = dma.vmem_to_hbm [thread:$0]  %s143_s0, 128, %s357_s4, [#allocation4]  }
 0x133   :  { %286 = dma.done.wait [#allocation4], 128  }
 0x134   :  { %287 = vsyncadd [#allocation4], 4294967168 }
 0x135   :  { %149 = vsyncpa [#allocation3], 1 }
 0x136   :  { %150 = vsyncpa [#allocation4], 1 }

</bundles_post_ra>
